<compile_context>
chip_gen: v7x
topology: tpu7x:2x2x1
jax: 0.10.0
libtpu: 0.0.40
codegen_flags: <defaults>
</compile_context>

<pallas_src>
import jax
import jax.numpy as jnp
from jax.experimental import pallas as pl
from jax.experimental.pallas import tpu as pltpu


# ---------------------------------------------------------------------------
# Fused Pallas kernel
# ---------------------------------------------------------------------------

def _gml_kernel(x1_ref, x2_ref, wf_ref, wz_ref, o_ref, xcat_ref):
    d1 = x1_ref.shape[1]
    h = o_ref.shape[1]

    # Assemble x = [x1 | x2] in a small VMEM scratch via static lane-slice
    # stores (no per-call concat op in the wrapper, no extra matmul).
    xcat_ref[:, :d1] = x1_ref[...]
    xcat_ref[:, d1:] = x2_ref[...]

    # Single MXU call against the block-diagonal fused weight -> [h1 | h2],
    # f32 accumulation, ReLU on the VPU.
    h12 = jnp.maximum(
        jnp.dot(xcat_ref[...], wf_ref[...],
                preferred_element_type=jnp.float32),
        0.0)                                                  # [B, 2H]

    # Gate logit: sigmoid([h1; h2] @ Wz.T) without the concat — broadcast
    # multiply against wz [1, 2H] and a lane reduction (XLU), sigmoid on EUP.
    z = jax.nn.sigmoid(jnp.sum(h12 * wz_ref[...], axis=-1, keepdims=True))

    # Gated mix of the two halves.
    h1 = h12[:, :h]
    h2 = h12[:, h:]
    o_ref[...] = z * h1 + (1.0 - z) * h2


# ---------------------------------------------------------------------------
# One-time parameter preparation (NOT part of the per-call forward path)
# ---------------------------------------------------------------------------

def prepare_gml_params(w1, w2, wz):
    """Fuse the PyTorch-layout weights once, at init time.

    w1: [H, D1] (hidden1.weight), w2: [H, D2] (hidden2.weight),
    wz: [1, 2H] (hidden_sigmoid.weight).

    Returns (w_fused [(D1+D2), 2H], wz [1, 2H]):  w_fused is block-diagonal
    with W1.T in the top-left and W2.T in the bottom-right, so
    [x1|x2] @ w_fused == [x1 @ W1.T | x2 @ W2.T].
    """
    h, d1 = w1.shape
    d2 = w2.shape[1]
    wf = jnp.zeros((d1 + d2, 2 * h), jnp.float32)
    wf = wf.at[:d1, :h].set(jnp.asarray(w1, jnp.float32).T)
    wf = wf.at[d1:, h:].set(jnp.asarray(w2, jnp.float32).T)
    return wf, jnp.asarray(wz, jnp.float32)


# ---------------------------------------------------------------------------
# Forward wrapper — just the pallas_call, nothing else
# ---------------------------------------------------------------------------

def _full_spec(shape):
    # Whole-array block (block_shape == array dims satisfies the (8,128)
    # rule).  index_map is pinned to block 0 — only valid for grid=(1,);
    # enlarge the grid with care (documented footgun).
    return pl.BlockSpec(shape, lambda i, n=len(shape): (0,) * n)


def gated_multimodal_layer(x1, x2, w_fused, wz):
    """x1: [B, D1], x2: [B, D2], w_fused: [(D1+D2), 2H], wz: [1, 2H] -> [B, H]."""
    bsz, d1 = x1.shape
    d2 = x2.shape[1]
    h = w_fused.shape[1] // 2

    args = (x1, x2, w_fused, wz)
    return pl.pallas_call(
        _gml_kernel,
        out_shape=jax.ShapeDtypeStruct((bsz, h), jnp.float32),
        grid=(1,),
        in_specs=[_full_spec(a.shape) for a in args],
        out_specs=_full_spec((bsz, h)),
        scratch_shapes=[pltpu.VMEM((bsz, d1 + d2), jnp.float32)],
        compiler_params=pltpu.CompilerParams(
            dimension_semantics=("arbitrary",)),
    )(*args)


gml_forward = jax.jit(gated_multimodal_layer)


# ---------------------------------------------------------------------------
# Deterministic parameter construction (PyTorch nn.Linear, bias=False)
# ---------------------------------------------------------------------------

def _linear_weight(key, fan_out, fan_in):
    bound = 1.0 / jnp.sqrt(jnp.float32(fan_in))
    return jax.random.uniform(key, (fan_out, fan_in), jnp.float32, -bound, bound)


# ---------------------------------------------------------------------------
# Demo + self-check
# ---------------------------------------------------------------------------

if __name__ == "__main__":
    key = jax.random.PRNGKey(0)
    k_x1, k_x2, k_w1, k_w2, k_wz = jax.random.split(key, 5)

    B = 8            # batch
    D1 = 64          # size_in1
    D2 = 48          # size_in2
    H = 16           # size_out

    x1 = jax.random.normal(k_x1, (B, D1), jnp.float32)
    x2 = jax.random.normal(k_x2, (B, D2), jnp.float32)

    w1 = _linear_weight(k_w1, H, D1)       # hidden1.weight   [H, D1]
    w2 = _linear_weight(k_w2, H, D2)       # hidden2.weight   [H, D2]
    wz = _linear_weight(k_wz, 1, 2 * H)    # hidden_sigmoid.weight [1, 2H]

    # One-time prep (init time), then the forward is a single pallas_call.
    w_fused, wz_p = prepare_gml_params(w1, w2, wz)

    out = gml_forward(x1, x2, w_fused, wz_p)
    out = jax.block_until_ready(out)

    # Pure-JAX reference (exact transcription of the PyTorch forward).
    h1_ref = jnp.maximum(x1 @ w1.T, 0.0)
    h2_ref = jnp.maximum(x2 @ w2.T, 0.0)
    z_ref = jax.nn.sigmoid(jnp.concatenate([h1_ref, h2_ref], axis=1) @ wz.T)
    ref = z_ref * h1_ref + (1.0 - z_ref) * h2_ref

    assert out.shape == (B, H)
    assert jnp.allclose(out, ref, atol=1e-5, rtol=1e-5), \
        f"max abs err {float(jnp.max(jnp.abs(out - ref)))}"

    print("KERNEL_OK")
</pallas_src>

<mosaic_0001>
module attributes {stable_mosaic.version = 11 : i64} {
  func.func @_gml_kernel(%arg0: i32, %arg1: memref<8x64xf32, #tpu.memory_space<vmem>>, %arg2: memref<8x48xf32, #tpu.memory_space<vmem>>, %arg3: memref<112x32xf32, #tpu.memory_space<vmem>>, %arg4: memref<1x32xf32, #tpu.memory_space<vmem>>, %arg5: memref<8x16xf32, #tpu.memory_space<vmem>>, %arg6: memref<8x112xf32, #tpu.memory_space<vmem>>) attributes {dimension_semantics = [#tpu.dimension_semantics<arbitrary>], iteration_bounds = array<i64: 1>, scalar_prefetch = 0 : i64, scratch_operands = 1 : i64, tpu.core_type = #tpu.core_type<tc>, window_params = [{pipeline_mode = #tpu.pipeline_mode<synchronous>, transform_indices = @transform_0, window_bounds = array<i64: 8, 64>}, {pipeline_mode = #tpu.pipeline_mode<synchronous>, transform_indices = @transform_1, window_bounds = array<i64: 8, 48>}, {pipeline_mode = #tpu.pipeline_mode<synchronous>, transform_indices = @transform_2, window_bounds = array<i64: 112, 32>}, {pipeline_mode = #tpu.pipeline_mode<synchronous>, transform_indices = @transform_3, window_bounds = array<i64: 1, 32>}, {pipeline_mode = #tpu.pipeline_mode<synchronous>, transform_indices = @transform_4, window_bounds = array<i64: 8, 16>}]} {
    %c0 = arith.constant 0 : index
    %c0_0 = arith.constant 0 : index
    %0 = vector.load %arg1[%c0, %c0_0] : memref<8x64xf32, #tpu.memory_space<vmem>>, vector<8x64xf32>
    %c0_1 = arith.constant 0 : index
    %c0_2 = arith.constant 0 : index
    %1 = vector.load %arg6[%c0_1, %c0_2] : memref<8x112xf32, #tpu.memory_space<vmem>>, vector<8x64xf32>
    tpu.vector_store %arg6[%c0_1, %c0_2], %0 {strides = array<i32>} : memref<8x112xf32, #tpu.memory_space<vmem>>, vector<8x64xf32>,
    %c0_3 = arith.constant 0 : index
    %c0_4 = arith.constant 0 : index
    %2 = vector.load %arg2[%c0_3, %c0_4] : memref<8x48xf32, #tpu.memory_space<vmem>>, vector<8x48xf32>
    %c0_5 = arith.constant 0 : index
    %c64 = arith.constant 64 : index
    %3 = vector.load %arg6[%c0_5, %c64] : memref<8x112xf32, #tpu.memory_space<vmem>>, vector<8x48xf32>
    tpu.vector_store %arg6[%c0_5, %c64], %2 {strides = array<i32>} : memref<8x112xf32, #tpu.memory_space<vmem>>, vector<8x48xf32>,
    %c0_6 = arith.constant 0 : index
    %c0_7 = arith.constant 0 : index
    %4 = vector.load %arg6[%c0_6, %c0_7] : memref<8x112xf32, #tpu.memory_space<vmem>>, vector<8x112xf32>
    %c0_8 = arith.constant 0 : index
    %c0_9 = arith.constant 0 : index
    %5 = vector.load %arg3[%c0_8, %c0_9] : memref<112x32xf32, #tpu.memory_space<vmem>>, vector<112x32xf32>
    %cst = arith.constant dense<0.000000e+00> : vector<8x32xf32>
    %6 = tpu.matmul %4, %5, %cst {dimension_numbers = #tpu.dot_dimension_numbers<[1], [0], [0], [1], [0, 0, 1, 1], [], []>} : vector<8x112xf32>, vector<112x32xf32>, vector<8x32xf32> -> vector<8x32xf32>
    %cst_10 = arith.constant 0.000000e+00 : f32
    %7 = vector.broadcast %cst_10 : f32 to vector<8x32xf32>
    %8 = arith.maximumf %6, %7 : vector<8x32xf32>
    %c0_11 = arith.constant 0 : index
    %c0_12 = arith.constant 0 : index
    %9 = vector.load %arg4[%c0_11, %c0_12] : memref<1x32xf32, #tpu.memory_space<vmem>>, vector<1x32xf32>
    %10 = vector.broadcast %9 : vector<1x32xf32> to vector<8x32xf32>
    %11 = arith.mulf %8, %10 : vector<8x32xf32>
    %cst_13 = arith.constant dense<0.000000e+00> : vector<8xf32>
    %12 = vector.multi_reduction <add>, %11, %cst_13 [1] : vector<8x32xf32> to vector<8xf32>
    %13 = vector.shape_cast %12 : vector<8xf32> to vector<8x1xf32>
    %14 = arith.negf %13 : vector<8x1xf32>
    %15 = math.exp %14 : vector<8x1xf32>
    %cst_14 = arith.constant 1.000000e+00 : f32
    %16 = vector.broadcast %cst_14 : f32 to vector<8x1xf32>
    %17 = arith.addf %16, %15 : vector<8x1xf32>
    %18 = arith.divf %16, %17 : vector<8x1xf32>
    %19 = vector.extract_strided_slice %8 {offsets = [0, 0], sizes = [8, 16], strides = [1, 1]} : vector<8x32xf32> to vector<8x16xf32>
    %20 = vector.extract_strided_slice %8 {offsets = [0, 16], sizes = [8, 16], strides = [1, 1]} : vector<8x32xf32> to vector<8x16xf32>
    %21 = vector.broadcast %18 : vector<8x1xf32> to vector<8x16xf32>
    %22 = arith.mulf %21, %19 : vector<8x16xf32>
    %cst_15 = arith.constant 1.000000e+00 : f32
    %23 = vector.broadcast %cst_15 : f32 to vector<8x1xf32>
    %24 = arith.subf %23, %18 : vector<8x1xf32>
    %25 = vector.broadcast %24 : vector<8x1xf32> to vector<8x16xf32>
    %26 = arith.mulf %25, %20 : vector<8x16xf32>
    %27 = arith.addf %22, %26 : vector<8x16xf32>
    %c0_16 = arith.constant 0 : index
    %c0_17 = arith.constant 0 : index
    %28 = vector.load %arg5[%c0_16, %c0_17] : memref<8x16xf32, #tpu.memory_space<vmem>>, vector<8x16xf32>
    tpu.vector_store %arg5[%c0_16, %c0_17], %27 {strides = array<i32>} : memref<8x16xf32, #tpu.memory_space<vmem>>, vector<8x16xf32>,
    return
  }
  func.func @transform_0(%arg0: i32) -> (i32, i32) {
    %c0_i32 = arith.constant 0 : i32
    %c0_i32_0 = arith.constant 0 : i32
    %c0_i32_1 = arith.constant 0 : i32
    return %c0_i32, %c0_i32_0 : i32, i32
  }
  func.func @transform_1(%arg0: i32) -> (i32, i32) {
    %c0_i32 = arith.constant 0 : i32
    %c0_i32_0 = arith.constant 0 : i32
    %c0_i32_1 = arith.constant 0 : i32
    return %c0_i32, %c0_i32_0 : i32, i32
  }
  func.func @transform_2(%arg0: i32) -> (i32, i32) {
    %c0_i32 = arith.constant 0 : i32
    %c0_i32_0 = arith.constant 0 : i32
    %c0_i32_1 = arith.constant 0 : i32
    return %c0_i32, %c0_i32_0 : i32, i32
  }
  func.func @transform_3(%arg0: i32) -> (i32, i32) {
    %c0_i32 = arith.constant 0 : i32
    %c0_i32_0 = arith.constant 0 : i32
    %c0_i32_1 = arith.constant 0 : i32
    return %c0_i32, %c0_i32_0 : i32, i32
  }
  func.func @transform_4(%arg0: i32) -> (i32, i32) {
    %c0_i32 = arith.constant 0 : i32
    %c0_i32_0 = arith.constant 0 : i32
    %c0_i32_1 = arith.constant 0 : i32
    return %c0_i32, %c0_i32_0 : i32, i32
  }
}

</mosaic_0001>

<bundles_post_ra>
// kernel: gated_multimodal_layer.1
= control target key start
LH: loop header
LB: loop body
LE: loop exit
PB: predicated region body
PF: predicated region fallthrough
CT: control target
= control target key end

     0   :  { %s264_s21 = smov 64   ;;  %v265_v3 = vmov 0.0|0.0   ;;  %vm19_vm0 = vcmask 523264   ;;  %vm266_vm1 = vmmov 0   ;;  %v267_v7 = vmov 0.0   ;;  %s358_s0 = inlined_call_operand.vmem [shape: f32[8,64], index: 0, kind: input, shape index: {}]   ;;  %s359_s1 = inlined_call_operand.vmem [shape: f32[8,48], index: 1, kind: input, shape index: {}]   ;;  %s360_s2 = inlined_call_operand.vmem [shape: f32[112,32], index: 2, kind: input, shape index: {}]   ;;  %s361_s3 = inlined_call_operand.vmem [shape: f32[1,32], index: 3, kind: input, shape index: {}]   ;;  %s362_s4 = inlined_call_operand.hbm [shape: f32[8,16], index: 4, kind: output, shape index: {}]  }
   0x1   :  { %v21_v0 = vld [vmem:[%s359_s1] sm:$0xff]  ;;  %v30_v2 = vld [vmem:[%s360_s2 + $0x8] sm:$0xff]  ;;  %209 = vmatprep.subr.bf16.mxu0 %v265_v3  ;;  %v31_v5 = vld [vmem:[%s360_s2 + $0x10] sm:$0xff]  ;;  %206 = vmatprep.mubr.msk.f32.mxu0 %vm266_vm1, %v267_v7 }
   0x2   :  { %v29_v1 = vld [vmem:[%s360_s2] sm:$0xff]  ;;  %23 = vrot.lane.b32.xlu0 %v21_v0, %s264_s21  ;;  %v32_v6 = vld [vmem:[%s360_s2 + $0x18] sm:$0xff]  ;;  %v34_v11 = vld [vmem:[%s360_s2 + $0x28] sm:$0xff] }
   0x3   :  { %v210_v4 = vpack.c.bf16 %v30_v2, %v29_v1  ;;  %v213_v8 = vpack.c.bf16 %v32_v6, %v31_v5  ;;  %v18_v9 = vld [vmem:[%s358_s0] sm:$0xff] }
   0x4   :  { %v33_v10 = vld [vmem:[%s360_s2 + $0x20] sm:$0xff]  ;;  %20 = vst.msk [vmem:[#allocation2] sm:$0xff] %vm19_vm0, %v18_v9 }
   0x5   :  { %211 = vmatpush3.bf16.msra.mxu0 %v210_v4 }
   0x6   :  { %212 = vmatprep.subr.bf16.mxu0 %v265_v3 }
   0x7   :  { %9 = vsyncpa [#allocation4], 0  ;;  %v216_v12 = vpack.c.bf16 %v34_v11, %v33_v10  ;;  %v35_v13 = vld [vmem:[%s360_s2 + $0x30] sm:$0xff]  ;;  %v36_v14 = vld [vmem:[%s360_s2 + $0x38] sm:$0xff]  ;;  %vm26_vm2 = vcmask 916992   ;;  %vm43_vm3 = vcmask 916480  }
   0x8   :  { %v219_v15 = vpack.c.bf16 %v36_v14, %v35_v13  ;;  %v37_v16 = vld [vmem:[%s360_s2 + $0x40] sm:$0xff]  ;;  %v38_v17 = vld [vmem:[%s360_s2 + $0x48] sm:$0xff]  ;;  %v39_v19 = vld [vmem:[%s360_s2 + $0x50] sm:$0xff]  ;;  %vm126_vm4 = vcmask 261120   ;;  %s269_s22 = smov [#allocation3]   ;;  %vm144_vm5 = vcmask 130048  }
   0x9   :  { %214 = vmatpush3.bf16.msra.mxu0 %v213_v8  ;;  %v222_v18 = vpack.c.bf16 %v38_v17, %v37_v16  ;;  %v40_v20 = vld [vmem:[%s360_s2 + $0x58] sm:$0xff]  ;;  %v41_v22 = vld [vmem:[%s360_s2 + $0x60] sm:$0xff]  ;;  %v42_v23 = vld [vmem:[%s360_s2 + $0x68] sm:$0xff]  ;;  %s268_s2 = smov 112   ;;  %s152_s23 = sshll.u32 %s269_s22, 4  ;;  %s153_s23 = int_to_ptr.vmem [resolvable:$true] %s152_s23 }
   0xa   :  { %215 = vmatprep.subr.bf16.mxu0 %v265_v3  ;;  %v225_v21 = vpack.c.bf16 %v40_v20, %v39_v19  ;;  %v228_v24 = vpack.c.bf16 %v42_v23, %v41_v22  ;;  %v161_v28 = vld [vmem:[%s361_s3] ss:$0 sm:$0xff]  ;;  %s240_s3 = scalar_lea.vmem %s153_s23, 128  ;;  %p245_p1 = scmp.lt.s32.totalorder %s153_s23, %s153_s23 }
   0xb   :  { %p241_p0 = scmp.ne.s32.totalorder %s153_s23, %s240_s3  ;;  %p246_p2 = scmp.lt.s32.totalorder %s240_s3, %s240_s3 }
   0xd   :  { %217 = vmatpush3.bf16.msra.mxu0 %v216_v12  ;;  %p247_p3 = por %p246_p2, %p245_p1 }
   0xe   :  { %218 = vmatprep.subr.bf16.mxu0 %v265_v3 }
   0xf   :  { %p248_p4 = pnand %p247_p3, %p241_p0 }
  0x11   :  { %220 = vmatpush3.bf16.msra.mxu0 %v219_v15 }
  0x12   :  { %221 = vmatprep.subr.bf16.mxu0 %v265_v3 }
  0x15   :  { %223 = vmatpush3.bf16.msra.mxu0 %v222_v18 }
  0x16   :  { %224 = vmatprep.subr.bf16.mxu0 %v265_v3 }
  0x19   :  { %226 = vmatpush3.bf16.msra.mxu0 %v225_v21 }
  0x1a   :  { %227 = vmatprep.subr.bf16.mxu0 %v265_v3 }
  0x1d   :  { %229 = vmatpush3.bf16.msra.mxu0 %v228_v24 }
  0x74   :  { %v24_v25 = vpop.permute.xlu0 %23 }
  0x75   :  { %27 = vst.msk [vmem:[#allocation2] sm:$0xff] %vm26_vm2, %v24_v25 }
  0x7c   :  { %v28_v26 = vld [vmem:[#allocation2] sm:$0xff] }
  0x7d   :  { %207 = vmatmul.mubr.msk.f32.vlgmr.msra.gmra.mrb[0].mxu0 %vm43_vm3, %v28_v26 }
 0x150   :  { %v113_v27 = vpop.f32.mrb[0].mxu0 }
 0x151   :  { %v117_v29 = vmax.f32 %v113_v27, 0.0  ;;  %v208_v30 = vpop.f32.mrb[1].mxu0 }
 0x153   :  { %v125_v31 = vmul.f32 %v161_v28, %v117_v29 }
 0x155   :  { %v127_v32 = vsel %vm126_vm4, %v125_v31, 0.0 }
 0x156   :  { %128 = vadd.xlane.f32.xlu0 %v127_v32 }
 0x1e3   :  { %v129_v33 = vpop.xlane.xlu0 %128 }
 0x1e4   :  { %v162_v34 = vmul.f32 -1.442695, %v129_v33 }
 0x1e6   :  { %236 = vpow2.f32 %v162_v34 }
 0x1f0   :  { %v237_v35 = vpop.eup %236 }
 0x1f1   :  { %v133_v36 = vadd.f32 1.0, %v237_v35 }
 0x1f3   :  { %238 = vrcp.f32 %v133_v36 }
 0x1fd   :  { %v239_v37 = vpop.eup %238 }
 0x1fe   :  { %v137_v38 = vsub.f32 1.0, %v239_v37  ;;  %v136_v40 = vmul.f32 %v239_v37, %v117_v29 }
 0x200   :  { %v138_v39 = vmul.f32 %v137_v38, %v117_v29 }
 0x202   :  { %140 = vrot.lane.b32.xlu1 %v138_v39, %s268_s2 }
 0x274   :  { %v141_v41 = vpop.permute.xlu1 %140 }
 0x275   :  { %v143_v42 = vadd.f32 %v141_v41, %v136_v40 }
 0x277   :  { %145 = vst.msk [vmem:[#allocation3] sm:$0xff] %vm144_vm5, %v143_v42 }
 0x278   :  { %251 = shalt.err (!%p248_p4)
}
 0x279   :  { %s252_s1 = scalar_lea.hbm %s362_s4, 128 }
 0x27a   :  { %p253_p5 = scmp.ne.s32.totalorder %s362_s4, %s252_s1  ;;  %p256_p6 = scmp.lt.u32.totalorder %s252_s1, %s362_s4 }
 0x27c   :  { %p258_p7 = pnand %p256_p6, %p253_p5 }
 0x27e   :  { %261 = shalt.err (!%p258_p7)
}
 0x27f   :  { %155 = dma.vmem_to_hbm [thread:$0]  %s153_s23, 128, %s362_s4, [#allocation4]  }
 0x280   :  { %262 = dma.done.wait [#allocation4], 128  }
 0x281   :  { %263 = vsyncadd [#allocation4], 4294967168 }
 0x282   :  { %159 = vsyncpa [#allocation4], 1 }

</bundles_post_ra>
